<compile_context>
chip_gen: v6e
topology: v6e:2x2x1
jax: 0.10.0
libtpu: 0.0.40
codegen_flags: <defaults>
</compile_context>

<pallas_src>
import functools
import math

import jax
import jax.numpy as jnp
from jax.experimental import pallas as pl
from jax.experimental.pallas import tpu as pltpu

_NUM_CORES = 2          # row-split width (v7x megacore); sequential on 1-TC chips
_NEG_INIT = -1e30       # finite "minus infinity" so shift bookkeeping never NaNs


def _mms_loss_kernel(s_ref, dcol_ref, acc_ref, shift_ref, csum_ref, *,
                     margin, n, tm, tiles_per_core):
    c = pl.program_id(0)          # core / row-half index
    i = pl.program_id(1)          # row-tile index within this core
    corr = jnp.float32(math.expm1(-margin))     # exp(-margin) - 1 (static)
    neg = jnp.float32(_NEG_INIT)

    @pl.when(i == 0)
    def _init():
        acc_ref[...] = jnp.zeros_like(acc_ref)
        shift_ref[...] = jnp.full_like(shift_ref, neg)
        csum_ref[...] = jnp.zeros_like(csum_ref)

    # Row-validity mask: handles N % TM != 0 and this core's padded tail tiles
    # (the DMA block index is clamped in the index_map; garbage rows are zeroed
    # here so no NaN/Inf can leak into any reduction).
    rows = (c * tiles_per_core + i) * tm + jax.lax.broadcasted_iota(
        jnp.int32, (tm, 1), 0)
    valid = rows < n                                              # (TM, 1) bool

    S = jnp.where(valid, s_ref[...].astype(jnp.float32), 0.0)     # (TM, N)
    d_col = dcol_ref[...].astype(jnp.float32)                     # (TM, 1)

    # ---- Row-wise LSE (I2C); margin folded in analytically via the diag ----
    m_row = jnp.max(S, axis=1, keepdims=True)                     # (TM, 1)
    E = jnp.exp(S - m_row)                                        # only full-tile exp
    sum_row = jnp.sum(E, axis=1, keepdims=True)                   # (TM, 1)
    sum_row = sum_row + jnp.exp(jnp.where(valid, d_col - m_row, 0.0)) * corr
    lse_row = m_row + jnp.log(sum_row)                            # (TM, 1)
    acc_ref[...] += jnp.sum(jnp.where(valid, lse_row, 0.0),
                            axis=0, keepdims=True)                # (1, 1)

    # ---- Column exp-sums (C2I): reuse E with a running scalar shift ----
    shift_old = shift_ref[...]                                    # (1, 1)
    tile_shift = jnp.max(jnp.where(valid, m_row, neg),
                         axis=0, keepdims=True)                   # (1, 1)
    shift_new = jnp.maximum(shift_old, tile_shift)
    w = jnp.where(valid, jnp.exp(m_row - shift_new), 0.0)         # (TM, 1)
    csum_ref[...] = (csum_ref[...] * jnp.exp(shift_old - shift_new)
                     + jnp.sum(E * w, axis=0, keepdims=True))     # (1, N)
    shift_ref[...] = shift_new


def _vmem_capacity_bytes():
    """Physical VMEM per core; conservative 64 MiB fallback (v7x per-TC)."""
    try:
        info = pltpu.get_tpu_info()
        cap = getattr(info, "vmem_capacity_bytes", None)
        if cap:
            return int(cap)
    except Exception:
        pass
    return 64 * 2 ** 20


def _pick_tile_rows(n, target, budget_bytes):
    """Largest row tile (multiple of 8, <= target) whose double-buffered f32
    input plus ~2 (TM, N) f32 elementwise temporaries fit the VMEM budget."""
    per_row = 16 * n                      # bytes/row: 2 input bufs + ~2 temps (f32)
    tm = min(int(target), max(int(budget_bytes // per_row), 8))
    if tm >= n:
        return n                          # one full-extent block is always legal
    return max((tm // 8) * 8, 8)


def mms_loss(S, margin=0.001, block_rows=1024):
    """Pallas-TPU equivalent of MMS_loss.forward(S, margin)."""
    n, m = S.shape
    assert n == m, "MMS loss expects a square similarity matrix"

    vmem_cap = _vmem_capacity_bytes()
    vmem_limit = int(min(vmem_cap - 4 * 2 ** 20, int(0.9 * vmem_cap)))
    tm = _pick_tile_rows(n, block_rows, int(0.70 * vmem_limit))

    nblocks = pl.cdiv(n, tm)                       # row tiles of S
    tiles_per_core = pl.cdiv(nblocks, _NUM_CORES)
    grid = (_NUM_CORES, tiles_per_core)

    d = jnp.diagonal(S).astype(jnp.float32)        # (N,) O(N) plumbing, done once
    d_col = d.reshape(n, 1)

    def s_map(c, i):
        # Clamp so padded tail tiles of the second core never DMA out of bounds;
        # their contribution is zeroed by the in-kernel row mask.
        return (jnp.minimum(c * tiles_per_core + i, nblocks - 1), 0)

    kernel = functools.partial(_mms_loss_kernel, margin=float(margin), n=n,
                               tm=tm, tiles_per_core=tiles_per_core)

    acc, shift, csum = pl.pallas_call(
        kernel,
        out_shape=(
            jax.ShapeDtypeStruct((_NUM_CORES, 1, 1), jnp.float32),  # partial row-lse sum
            jax.ShapeDtypeStruct((_NUM_CORES, 1, 1), jnp.float32),  # per-core scalar shift
            jax.ShapeDtypeStruct((_NUM_CORES, 1, n), jnp.float32),  # per-core col exp-sums
        ),
        grid=grid,
        in_specs=[
            pl.BlockSpec((tm, n), s_map),          # row tile of S
            pl.BlockSpec((tm, 1), s_map),          # diag entries of these rows
        ],
        out_specs=(
            pl.BlockSpec((None, 1, 1), lambda c, i: (c, 0, 0)),
            pl.BlockSpec((None, 1, 1), lambda c, i: (c, 0, 0)),
            pl.BlockSpec((None, 1, n), lambda c, i: (c, 0, 0)),
        ),
        compiler_params=pltpu.CompilerParams(
            dimension_semantics=("parallel", "arbitrary"),
            vmem_limit_bytes=vmem_limit,
        ),
    )(S, d_col)

    # O(N) epilogue: merge per-core partial column stats, apply the analytic
    # margin correction, and assemble the scalar loss.
    corr = math.expm1(-margin)
    m_all = jnp.max(shift, axis=0)                             # (1, 1)
    s_all = jnp.sum(csum * jnp.exp(shift - m_all), axis=0)     # (1, N)
    s_all = s_all + jnp.exp(d[None, :] - m_all) * corr
    lse_col = m_all + jnp.log(s_all)                           # (1, N)
    total = jnp.sum(acc) + jnp.sum(lse_col) - 2.0 * jnp.sum(d)
    return total / jnp.float32(n) + 2.0 * jnp.float32(margin)


def _mms_loss_ref(S, margin=0.001):
    """Pure-JAX reference (mirrors the PyTorch forward)."""
    n = S.shape[0]
    S = S - margin * jnp.eye(n, dtype=S.dtype)
    log_p_row = jax.nn.log_softmax(S, axis=1)
    log_p_col = jax.nn.log_softmax(S.T, axis=1)
    idx = jnp.arange(n)
    i2c = -jnp.mean(log_p_row[idx, idx])
    c2i = -jnp.mean(log_p_col[idx, idx])
    return i2c + c2i


if __name__ == "__main__":
    key = jax.random.PRNGKey(0)
    k1, k2 = jax.random.split(key)

    # Case 1: small shape consistent with the module (batch=8, hidden=32);
    # S is a cosine-similarity matrix -> single row tile, second core fully
    # masked (exercises the masked / clamped-tile path).
    emb = jax.random.normal(k1, (8, 32), dtype=jnp.float32)
    emb = emb / jnp.linalg.norm(emb, axis=1, keepdims=True)
    S = emb @ emb.T
    loss = jax.block_until_ready(mms_loss(S, margin=0.001))
    ref = _mms_loss_ref(S, margin=0.001)
    assert jnp.allclose(loss, ref, atol=1e-4, rtol=1e-4), (loss, ref)

    # Case 2: 300 rows with a 128-row tile -> 3 real tiles split over the two
    # grid "cores" (core 0: tiles 0-1, core 1: tile 2 + one clamped padded
    # tile), exercising the tail mask, the online scalar-shift column softmax
    # and the cross-core combine epilogue.
    emb2 = jax.random.normal(k2, (300, 64), dtype=jnp.float32)
    emb2 = emb2 / jnp.linalg.norm(emb2, axis=1, keepdims=True)
    S2 = emb2 @ emb2.T
    loss2 = jax.block_until_ready(mms_loss(S2, margin=0.001, block_rows=128))
    ref2 = _mms_loss_ref(S2, margin=0.001)
    assert jnp.allclose(loss2, ref2, atol=1e-4, rtol=1e-4), (loss2, ref2)

    print("KERNEL_OK")
</pallas_src>

<mosaic_0001>
module attributes {stable_mosaic.version = 11 : i64} {
  func.func @_mms_loss_kernel(%arg0: i32, %arg1: i32, %arg2: memref<8x8xf32, #tpu.memory_space<vmem>>, %arg3: memref<8x1xf32, #tpu.memory_space<vmem>>, %arg4: memref<1x1x1xf32, #tpu.memory_space<vmem>>, %arg5: memref<1x1x1xf32, #tpu.memory_space<vmem>>, %arg6: memref<1x1x8xf32, #tpu.memory_space<vmem>>) attributes {dimension_semantics = [#tpu.dimension_semantics<parallel>, #tpu.dimension_semantics<arbitrary>], iteration_bounds = array<i64: 2, 1>, scalar_prefetch = 0 : i64, scratch_operands = 0 : i64, tpu.core_type = #tpu.core_type<tc>, window_params = [{transform_indices = @transform_0, window_bounds = array<i64: 8, 8>}, {transform_indices = @transform_1, window_bounds = array<i64: 8, 1>}, {transform_indices = @transform_2, window_bounds = array<i64: 1, 1, 1>}, {transform_indices = @transform_3, window_bounds = array<i64: 1, 1, 1>}, {transform_indices = @transform_4, window_bounds = array<i64: 1, 1, 8>}]} {
    %c0_i32 = arith.constant 0 : i32
    %0 = arith.cmpi eq, %arg1, %c0_i32 : i32
    %1 = arith.extui %0 : i1 to i32
    %cst = arith.constant -1.000000e+30 : f32
    %c0_i32_0 = arith.constant 0 : i32
    %2 = arith.cmpi ne, %1, %c0_i32_0 : i32
    scf.if %2 {
      %cst_34 = arith.constant 0.000000e+00 : f32
      %72 = vector.broadcast %cst_34 : f32 to vector<1x1xf32>
      %c0_35 = arith.constant 0 : index
      %c0_36 = arith.constant 0 : index
      %c0_37 = arith.constant 0 : index
      %73 = vector.load %arg4[%c0_35, %c0_36, %c0_37] : memref<1x1x1xf32, #tpu.memory_space<vmem>>, vector<1x1x1xf32>
      %74 = vector.shape_cast %73 : vector<1x1x1xf32> to vector<1x1xf32>
      %75 = vector.shape_cast %72 : vector<1x1xf32> to vector<1x1x1xf32>
      tpu.vector_store %arg4[%c0_35, %c0_36, %c0_37], %75 {strides = array<i32>} : memref<1x1x1xf32, #tpu.memory_space<vmem>>, vector<1x1x1xf32>,
      %76 = vector.broadcast %cst : f32 to vector<1x1xf32>
      %c0_38 = arith.constant 0 : index
      %c0_39 = arith.constant 0 : index
      %c0_40 = arith.constant 0 : index
      %77 = vector.load %arg5[%c0_38, %c0_39, %c0_40] : memref<1x1x1xf32, #tpu.memory_space<vmem>>, vector<1x1x1xf32>
      %78 = vector.shape_cast %77 : vector<1x1x1xf32> to vector<1x1xf32>
      %79 = vector.shape_cast %76 : vector<1x1xf32> to vector<1x1x1xf32>
      tpu.vector_store %arg5[%c0_38, %c0_39, %c0_40], %79 {strides = array<i32>} : memref<1x1x1xf32, #tpu.memory_space<vmem>>, vector<1x1x1xf32>,
      %cst_41 = arith.constant 0.000000e+00 : f32
      %80 = vector.broadcast %cst_41 : f32 to vector<1x8xf32>
      %c0_42 = arith.constant 0 : index
      %c0_43 = arith.constant 0 : index
      %c0_44 = arith.constant 0 : index
      %81 = vector.load %arg6[%c0_42, %c0_43, %c0_44] : memref<1x1x8xf32, #tpu.memory_space<vmem>>, vector<1x1x8xf32>
      %82 = vector.shape_cast %81 : vector<1x1x8xf32> to vector<1x8xf32>
      %83 = vector.shape_cast %80 : vector<1x8xf32> to vector<1x1x8xf32>
      tpu.vector_store %arg6[%c0_42, %c0_43, %c0_44], %83 {strides = array<i32>} : memref<1x1x8xf32, #tpu.memory_space<vmem>>, vector<1x1x8xf32>,
    } else {
    }
    %c1_i32 = arith.constant 1 : i32
    %3 = arith.muli %arg0, %c1_i32 : i32
    %4 = arith.addi %3, %arg1 : i32
    %c8_i32 = arith.constant 8 : i32
    %5 = arith.muli %4, %c8_i32 : i32
    %6 = tpu.iota {dimensions = array<i32: 0>} : vector<8x1xi32>
    %7 = vector.broadcast %5 : i32 to vector<8x1xi32>
    %8 = arith.addi %7, %6 : vector<8x1xi32>
    %c8_i32_1 = arith.constant 8 : i32
    %9 = vector.broadcast %c8_i32_1 : i32 to vector<8x1xi32>
    %10 = arith.cmpi slt, %8, %9 : vector<8x1xi32>
    %c0 = arith.constant 0 : index
    %c0_2 = arith.constant 0 : index
    %11 = vector.load %arg2[%c0, %c0_2] : memref<8x8xf32, #tpu.memory_space<vmem>>, vector<8x8xf32>
    %cst_3 = arith.constant 0.000000e+00 : f32
    %12 = vector.shape_cast %10 : vector<8x1xi1> to vector<8x1xi1>
    %13 = vector.broadcast %12 : vector<8x1xi1> to vector<8x8xi1>
    %14 = vector.broadcast %cst_3 : f32 to vector<8x8xf32>
    %15 = arith.select %13, %11, %14 : vector<8x8xi1>, vector<8x8xf32>
    %c0_4 = arith.constant 0 : index
    %c0_5 = arith.constant 0 : index
    %16 = vector.load %arg3[%c0_4, %c0_5] : memref<8x1xf32, #tpu.memory_space<vmem>>, vector<8x1xf32>
    %cst_6 = arith.constant dense<0xFF800000> : vector<8xf32>
    %17 = vector.multi_reduction <maximumf>, %15, %cst_6 [1] : vector<8x8xf32> to vector<8xf32>
    %18 = vector.shape_cast %17 : vector<8xf32> to vector<8x1xf32>
    %19 = vector.broadcast %18 : vector<8x1xf32> to vector<8x8xf32>
    %20 = arith.subf %15, %19 : vector<8x8xf32>
    %21 = math.exp %20 : vector<8x8xf32>
    %cst_7 = arith.constant dense<0.000000e+00> : vector<8xf32>
    %22 = vector.multi_reduction <add>, %21, %cst_7 [1] : vector<8x8xf32> to vector<8xf32>
    %23 = vector.shape_cast %22 : vector<8xf32> to vector<8x1xf32>
    %24 = arith.subf %16, %18 : vector<8x1xf32>
    %cst_8 = arith.constant 0.000000e+00 : f32
    %25 = vector.broadcast %cst_8 : f32 to vector<8x1xf32>
    %26 = arith.select %10, %24, %25 : vector<8x1xi1>, vector<8x1xf32>
    %27 = math.exp %26 : vector<8x1xf32>
    %cst_9 = arith.constant -9.9950016E-4 : f32
    %28 = vector.broadcast %cst_9 : f32 to vector<8x1xf32>
    %29 = arith.mulf %27, %28 : vector<8x1xf32>
    %30 = arith.addf %23, %29 : vector<8x1xf32>
    %31 = math.log %30 : vector<8x1xf32>
    %32 = arith.addf %18, %31 : vector<8x1xf32>
    %c0_10 = arith.constant 0 : index
    %c0_11 = arith.constant 0 : index
    %c0_12 = arith.constant 0 : index
    %33 = vector.load %arg4[%c0_10, %c0_11, %c0_12] : memref<1x1x1xf32, #tpu.memory_space<vmem>>, vector<1x1x1xf32>
    %34 = vector.shape_cast %33 : vector<1x1x1xf32> to vector<1x1xf32>
    %cst_13 = arith.constant 0.000000e+00 : f32
    %35 = vector.broadcast %cst_13 : f32 to vector<8x1xf32>
    %36 = arith.select %10, %32, %35 : vector<8x1xi1>, vector<8x1xf32>
    %cst_14 = arith.constant dense<0.000000e+00> : vector<1xf32>
    %37 = vector.multi_reduction <add>, %36, %cst_14 [0] : vector<8x1xf32> to vector<1xf32>
    %38 = vector.shape_cast %37 : vector<1xf32> to vector<1x1xf32>
    %39 = arith.addf %34, %38 : vector<1x1xf32>
    %c0_15 = arith.constant 0 : index
    %c0_16 = arith.constant 0 : index
    %c0_17 = arith.constant 0 : index
    %40 = vector.load %arg4[%c0_15, %c0_16, %c0_17] : memref<1x1x1xf32, #tpu.memory_space<vmem>>, vector<1x1x1xf32>
    %41 = vector.shape_cast %40 : vector<1x1x1xf32> to vector<1x1xf32>
    %42 = vector.shape_cast %39 : vector<1x1xf32> to vector<1x1x1xf32>
    tpu.vector_store %arg4[%c0_15, %c0_16, %c0_17], %42 {strides = array<i32>} : memref<1x1x1xf32, #tpu.memory_space<vmem>>, vector<1x1x1xf32>,
    %c0_18 = arith.constant 0 : index
    %c0_19 = arith.constant 0 : index
    %c0_20 = arith.constant 0 : index
    %43 = vector.load %arg5[%c0_18, %c0_19, %c0_20] : memref<1x1x1xf32, #tpu.memory_space<vmem>>, vector<1x1x1xf32>
    %44 = vector.shape_cast %43 : vector<1x1x1xf32> to vector<1x1xf32>
    %cst_21 = arith.constant -1.000000e+30 : f32
    %45 = vector.broadcast %cst_21 : f32 to vector<8x1xf32>
    %46 = arith.select %10, %18, %45 : vector<8x1xi1>, vector<8x1xf32>
    %cst_22 = arith.constant dense<0xFF800000> : vector<1xf32>
    %47 = vector.multi_reduction <maximumf>, %46, %cst_22 [0] : vector<8x1xf32> to vector<1xf32>
    %48 = vector.shape_cast %47 : vector<1xf32> to vector<1x1xf32>
    %49 = arith.maximumf %44, %48 : vector<1x1xf32>
    %50 = vector.broadcast %49 : vector<1x1xf32> to vector<8x1xf32>
    %51 = arith.subf %18, %50 : vector<8x1xf32>
    %52 = math.exp %51 : vector<8x1xf32>
    %cst_23 = arith.constant 0.000000e+00 : f32
    %53 = vector.broadcast %cst_23 : f32 to vector<8x1xf32>
    %54 = arith.select %10, %52, %53 : vector<8x1xi1>, vector<8x1xf32>
    %c0_24 = arith.constant 0 : index
    %c0_25 = arith.constant 0 : index
    %c0_26 = arith.constant 0 : index
    %55 = vector.load %arg6[%c0_24, %c0_25, %c0_26] : memref<1x1x8xf32, #tpu.memory_space<vmem>>, vector<1x1x8xf32>
    %56 = vector.shape_cast %55 : vector<1x1x8xf32> to vector<1x8xf32>
    %57 = arith.subf %44, %49 : vector<1x1xf32>
    %58 = math.exp %57 : vector<1x1xf32>
    %59 = vector.broadcast %58 : vector<1x1xf32> to vector<1x8xf32>
    %60 = arith.mulf %56, %59 : vector<1x8xf32>
    %61 = vector.broadcast %54 : vector<8x1xf32> to vector<8x8xf32>
    %62 = arith.mulf %21, %61 : vector<8x8xf32>
    %cst_27 = arith.constant dense<0.000000e+00> : vector<8xf32>
    %63 = vector.multi_reduction <add>, %62, %cst_27 [0] : vector<8x8xf32> to vector<8xf32>
    %64 = vector.shape_cast %63 : vector<8xf32> to vector<1x8xf32>
    %65 = arith.addf %60, %64 : vector<1x8xf32>
    %c0_28 = arith.constant 0 : index
    %c0_29 = arith.constant 0 : index
    %c0_30 = arith.constant 0 : index
    %66 = vector.load %arg6[%c0_28, %c0_29, %c0_30] : memref<1x1x8xf32, #tpu.memory_space<vmem>>, vector<1x1x8xf32>
    %67 = vector.shape_cast %66 : vector<1x1x8xf32> to vector<1x8xf32>
    %68 = vector.shape_cast %65 : vector<1x8xf32> to vector<1x1x8xf32>
    tpu.vector_store %arg6[%c0_28, %c0_29, %c0_30], %68 {strides = array<i32>} : memref<1x1x8xf32, #tpu.memory_space<vmem>>, vector<1x1x8xf32>,
    %c0_31 = arith.constant 0 : index
    %c0_32 = arith.constant 0 : index
    %c0_33 = arith.constant 0 : index
    %69 = vector.load %arg5[%c0_31, %c0_32, %c0_33] : memref<1x1x1xf32, #tpu.memory_space<vmem>>, vector<1x1x1xf32>
    %70 = vector.shape_cast %69 : vector<1x1x1xf32> to vector<1x1xf32>
    %71 = vector.shape_cast %49 : vector<1x1xf32> to vector<1x1x1xf32>
    tpu.vector_store %arg5[%c0_31, %c0_32, %c0_33], %71 {strides = array<i32>} : memref<1x1x1xf32, #tpu.memory_space<vmem>>, vector<1x1x1xf32>,
    return
  }
  func.func @transform_0(%arg0: i32, %arg1: i32) -> (i32, i32) {
    %c1_i32 = arith.constant 1 : i32
    %0 = arith.muli %arg0, %c1_i32 : i32
    %1 = arith.addi %0, %arg1 : i32
    %c0_i32 = arith.constant 0 : i32
    %2 = arith.minsi %1, %c0_i32 : i32
    %c0_i32_0 = arith.constant 0 : i32
    %c0_i32_1 = arith.constant 0 : i32
    return %2, %c0_i32_0 : i32, i32
  }
  func.func @transform_1(%arg0: i32, %arg1: i32) -> (i32, i32) {
    %c1_i32 = arith.constant 1 : i32
    %0 = arith.muli %arg0, %c1_i32 : i32
    %1 = arith.addi %0, %arg1 : i32
    %c0_i32 = arith.constant 0 : i32
    %2 = arith.minsi %1, %c0_i32 : i32
    %c0_i32_0 = arith.constant 0 : i32
    %c0_i32_1 = arith.constant 0 : i32
    return %2, %c0_i32_0 : i32, i32
  }
  func.func @transform_2(%arg0: i32, %arg1: i32) -> (i32, i32, i32) {
    %c0_i32 = arith.constant 0 : i32
    %c0_i32_0 = arith.constant 0 : i32
    %c0_i32_1 = arith.constant 0 : i32
    return %arg0, %c0_i32, %c0_i32_0 : i32, i32, i32
  }
  func.func @transform_3(%arg0: i32, %arg1: i32) -> (i32, i32, i32) {
    %c0_i32 = arith.constant 0 : i32
    %c0_i32_0 = arith.constant 0 : i32
    %c0_i32_1 = arith.constant 0 : i32
    return %arg0, %c0_i32, %c0_i32_0 : i32, i32, i32
  }
  func.func @transform_4(%arg0: i32, %arg1: i32) -> (i32, i32, i32) {
    %c0_i32 = arith.constant 0 : i32
    %c0_i32_0 = arith.constant 0 : i32
    %c0_i32_1 = arith.constant 0 : i32
    return %arg0, %c0_i32, %c0_i32_0 : i32, i32, i32
  }
}

</mosaic_0001>

<bundles_post_ra>
// kernel: tpu_custom_call.1
= control target key start
LH: loop header
LB: loop body
LE: loop exit
PB: predicated region body
PF: predicated region fallthrough
CT: control target
= control target key end

     0   :  { %10 = vsyncpa [#allocation3], 0  ;;  %s897_s0 = inlined_call_operand.vmem [shape: f32[8,8], index: 0, kind: input, shape index: {}]   ;;  %s898_s1 = inlined_call_operand.vmem [shape: f32[8,1], index: 1, kind: input, shape index: {}]   ;;  %s899_s2 = inlined_call_operand.vmem [shape: f32[2,1,1], index: 2, kind: output, shape index: {0}]   ;;  %s900_s3 = inlined_call_operand.vmem [shape: f32[2,1,1], index: 3, kind: output, shape index: {1}]   ;;  %s901_s4 = inlined_call_operand.hbm [shape: f32[2,1,8], index: 4, kind: output, shape index: {2}]  }
   0x1   :  { %12 = vsyncpa [#allocation3 + $0x1], 0  ;;  %s715_s15 = smov 0   ;;  %s717_s16 = smov 0  }
   0x2   :  { %s719_s17 = smov 0   ;;  %s721_s18 = smov 0  }
   0x3   :  { %s723_s19 = smov 0   ;;  %s725_s20 = smov 0  }
   0x4 LB: > { %s521_s21 = sadd.s32 4294967295, %s684_s20   ;;  %s522_s22 = sadd.s32 4294967294, %s684_s20   ;;  %s684_s20 = sphi %s725_s20, %s18_s20   ;;  %s680_s19 = sphi %s723_s19, %s908_s19   ;;  %s676_s18 = sphi %s721_s18, %s907_s18   ;;  %s672_s17 = sphi %s719_s17, %s906_s17   ;;  %s668_s16 = sphi %s717_s16, %s905_s16   ;;  %s664_s15 = sphi %s715_s15, %s904_s15  }
   0x5   : > { %s30_s23 = sadd.s32 1, %s680_s19  ;;  %s153_s24 = sadd.s32 1, %s672_s17 }
   0x6   : > { %p32_p0 = scmp.ge.s32.totalorder %s30_s23, 2  ;;  %p163_p1 = scmp.ne.s32.totalorder %s672_s17, %s668_s16 }
   0x7   : > { %p164_p2 = scmp.eq.s32.totalorder %s521_s21, 1  ;;  %p169_p3 = scmp.ne.s32.totalorder %s668_s16, %s664_s15 }
   0x8   : > { %s910_s23 = smov (%p32_p0, %s30_s23), 0  ;;  %p170_p5 = scmp.eq.s32.totalorder %s522_s22, 1 }
   0x9   : > { %p755_p4 = por %p164_p2, %p163_p1  ;;  %s150_s26 = ssub.s32 %s680_s19, %s910_s23 }
   0xa   : > { %p525_p6 = scmp.ge.s32.totalorder %s684_s20, 1  ;;  %p151_p7 = scmp.eq.s32.totalorder %s150_s26, 0 }
   0xb   : > { %p762_p8 = por %p170_p5, %p169_p3  ;;  %p214_p9 = scmp.lt.s32.totalorder %s684_s20, 3 }
   0xc   : > { %s768_s28 = scalar_select %p151_p7, %s672_s17, %s153_s24  }
   0xd   : > { %p215_p10 = pnand %p525_p6, %p214_p9 }
   0xe   : > { %p255_p11 = scmp.lt.s32.totalorder (!%p215_p10), %s676_s18, 0  ;;  %s534_s29 = sshll.u32 (!%p215_p10), %s676_s18, 3 }
   0xf   : > { %218 = sbr.rel (%p215_p10) target bundleno = 372 (0x174), region = 28  ;;  %p274_p12 = scmp.lt.s32.totalorder (!%p215_p10), %s676_s18, 1 }
  0x10   : > { %s252_s13 = sand.u32 (!%p215_p10), 1, %s668_s16   ;;  %s689_s11 = smov (!%p215_p10), [#allocation2]  }
  0x11   : > { %s812_s14 = scalar_lea.vmem (!%p215_p10), [#allocation2], %s252_s13 }
  0x14   : > { %v291_v0 = vlaneseq  ;;  %v293_v1 = vstv %s534_s29  ;;  %s256_s30 = scalar_select %p255_p11, %s676_s18, 0  ;;  %vm284_vm0 = vcmask 0   ;;  %v686_v4 = vmov -1e+30  }
  0x15   : > { %s777_s5 = scalar_select %p274_p12, %s676_s18, 1  ;;  %vm301_vm2 = vcmask 64512   ;;  %v687_v8 = vmov 0   ;;  %vm287_vm3 = vcmask 57344   ;;  %v688_v29 = vmov 0.0  }
  0x16   : > { %v774_v2 = vshrl.u32 %v291_v0, 7  ;;  %s912_s30 = smov (!%p255_p11, %s256_s30), 0  ;;  %596 = vset.pattern.permute.xlu1 %v687_v8  ;;  %597 = vset.pattern.permute.xlu0 %v687_v8  ;;  %288 = vst.msk [vmem:[%s812_s14] sm:$0x1] %vm287_vm3, %v688_v29  ;;  %vm322_vm4 = vcmask 7168  }
  0x17   : > { %s279_s8 = scalar_lea.vmem %s900_s3, %s777_s5  ;;  %s529_s9 = sshll.u32 %s912_s30, 3 }
  0x18   : > { %v782_v3 = vadd.s32 %v293_v1, %v774_v2  ;;  %286 = vst.msk [vmem:[%s279_s8] sm:$0x1] %vm284_vm0, %v686_v4  ;;  %s260_s12 = scalar_lea.vmem %s897_s0, %s529_s9  ;;  %v345_v19 = vsub.s32 0, %v774_v2  ;;  %s822_s24 = scalar_lea.vmem %s899_s2, %s777_s5 }
  0x19   : > { %v296_v5 = vld [vmem:[%s260_s12] sm:$0xff]  ;;  %285 = vst.msk [vmem:[%s822_s24] sm:$0x1] %vm284_vm0, %v688_v29  ;;  %s270_s6 = scalar_lea.vmem %s898_s1, %s529_s9  ;;  %s535_s30 = sshll.u32 %s676_s18, 4 }
  0x1a   : > { %vm295_vm1 = vcmp.lt.s32.totalorder %v782_v3, 8  ;;  %v300_v33 = vld [vmem:[%s270_s6] sm:$0xff]  ;;  %s408_s5 = sshll.u32 %s812_s14, 4  ;;  %s842_s9 = scalar_lea.hbm %s901_s4, %s535_s30  ;;  %s844_s5 = int_to_ptr.vmem [resolvable:$true] %s408_s5 }
  0x1b   : > { %v299_v6 = vsel %vm295_vm1, %v296_v5, 0.0  ;;  %s390_s18 = scalar_lea.sflag [#allocation3], %s252_s13  ;;  %s608_s10 = scalar_lea.vmem %s844_s5, 16 }
  0x1c   : > { %v302_v7 = vsel %vm301_vm2, %v299_v6, -inf  ;;  %p609_p13 = scmp.ne.s32.totalorder %s844_s5, %s608_s10  ;;  %s612_s12 = sshll.u32 %s689_s11, 4  ;;  %s613_s12 = int_to_ptr.vmem [resolvable:$false] %s612_s12 }
  0x1d   : > { %303 = vmax.xlane.f32.xlu0 %v302_v7  ;;  %v352_v50 = vld [vmem:[%s812_s14] sm:$0x1]  ;;  %s614_s21 = scalar_lea.vmem %s613_s12, 32  ;;  %p615_p2 = scmp.lt.s32.totalorder %s844_s5, %s613_s12 }
  0x1e   : > { %p610_p0 = pnand %p609_p13, %p755_p4  ;;  %p616_p3 = scmp.lt.s32.totalorder %s614_s21, %s608_s10 }
  0x1f   : > { %v333_v18 = vld [vmem:[%s279_s8] sm:$0x1] }
  0x20   : > { %p611_p1 = pneg %p610_p0  ;;  %p617_p5 = por %p616_p3, %p615_p2 }
  0x22   : > { %p618_p6 = pnand %p617_p5, %p611_p1 }
  0xa6   : > { %v799_v9 = vpop.xlane.xlu0 %303 }
  0xa7   : > { %v305_v10 = vsub.f32 %v299_v6, %v799_v9  ;;  %v334_v11 = vsel %vm295_vm1, %v799_v9, -1e+30  ;;  %v311_v34 = vsub.f32 %v300_v33, %v799_v9 }
  0xa8   : > { %v335_v12 = vrot.slane %v334_v11, 4 }
  0xa9   : > { %v306_v13 = vmul.f32 1.442695, %v305_v10  ;;  %v312_v35 = vsel %vm295_vm1, %v311_v34, 0.0 }
  0xaa   : > { %v336_v14 = vmax.f32 %v334_v11, %v335_v12  ;;  %v313_v36 = vmul.f32 1.442695, %v312_v35 }
  0xab   : > { %598 = vpow2.f32 %v306_v13 }
  0xac   : > { %v337_v15 = vrot.slane %v336_v14, 2 }
  0xae   : > { %v338_v16 = vmax.f32 %v336_v14, %v337_v15 }
  0xb0   : > { %v339_v17 = vrot.slane %v338_v16, 1 }
  0xb2   : > { %v340_v20 = vmax.f32 %v338_v16, %v339_v17 }
  0xb4   : > { %v341_v21 = vmax.f32 %v333_v18, %v340_v20 }
  0xb6   : > { %v346_v22 = vrot.slane %v341_v21, %v345_v19  ;;  %382 = vst.msk [vmem:[%s279_s8] sm:$0x1] %vm284_vm0, %v341_v21  ;;  %v353_v25 = vsub.f32 %v333_v18, %v341_v21 }
  0xb8   : > { %v599_v23 = vpop.eup %598  ;;  %v348_v24 = vsub.f32 %v799_v9, %v346_v22  ;;  %v354_v28 = vmul.f32 1.442695, %v353_v25 }
  0xb9   : > { %v308_v26 = vsel %vm301_vm2, %v599_v23, 0.0 }
  0xba   : > { %v349_v27 = vmul.f32 1.442695, %v348_v24  ;;  %309 = vadd.xlane.f32.xlu0 %v308_v26 }
  0xbc   : > { %600 = vpow2.f32 %v349_v27 }
  0xbd   : > { %602 = vpow2.f32 %v354_v28 }
  0xbe   : > { %604 = vpow2.f32 %v313_v36 }
  0xc9   : > { %v601_v30 = vpop.eup %600 }
  0xca   : > { %v351_v31 = vsel %vm295_vm1, %v601_v30, 0.0  ;;  %v603_v32 = vpop.eup %602 }
  0xcb   : > { %368 = vperm.xlu1 %596, %v351_v31   ;;  %v605_v37 = vpop.eup %604 }
  0xcc   : > { %v315_v38 = vmul.f32 -0.0009995002, %v605_v37 }
  0xcf   : > { %358 = vperm.xlu1 %596, %v603_v32  }
 0x143   : > { %v310_v39 = vpop.xlane.xlu0 %309 }
 0x144   : > { %v316_v40 = vadd.f32 %v315_v38, %v310_v39 }
 0x146   : > { %606 = vlog2.f32 %v316_v40  ;;  %v369_v41 = vpop.permute.xlu1 %368 }
 0x147   : > { %v371_v42 = vmul.f32 %v599_v23, %v369_v41 }
 0x149   : > { %v372_v43 = vsel %vm301_vm2, %v371_v42, 0.0 }
 0x14a   : > { %v373_v44 = vrot.slane %v372_v43, 4  ;;  %v359_v46 = vpop.permute.xlu1 %358 }
 0x14b   : > { %v364_v49 = vrot.slane %v359_v46, %v345_v19 }
 0x14c   : > { %v374_v45 = vadd.f32 %v373_v44, %v372_v43 }
 0x14d   : > { %v365_v54 = vmul.f32 %v364_v49, %v352_v50 }
 0x14e   : > { %v375_v47 = vrot.slane %v374_v45, 2 }
 0x150   : > { %v376_v48 = vadd.f32 %v375_v47, %v374_v45 }
 0x152   : > { %v377_v51 = vrot.slane %v376_v48, 1 }
 0x153   : > { %v607_v52 = vpop.eup %606 }
 0x154   : > { %v318_v53 = vmul.f32 0.6931472, %v607_v52  ;;  %v378_v55 = vadd.f32 %v377_v51, %v376_v48 }
 0x156   : > { %v319_v56 = vadd.f32 %v318_v53, %v799_v9  ;;  %v379_v57 = vadd.f32 %v378_v55, %v365_v54 }
 0x158   : > { %v321_v58 = vsel %vm295_vm1, %v319_v56, 0.0  ;;  %381 = vst.msk [vmem:[%s812_s14] sm:$0x1] %vm287_vm3, %v379_v57 }
 0x159   : > { %v323_v59 = vsel %vm322_vm4, %v321_v58, 0.0 }
 0x15a   : > { %621 = shalt.err (!%p618_p6)
}
 0x15b   : > { %s622_s14 = scalar_lea.hbm %s842_s9, 16  ;;  %s626_s26 = scalar_lea.hbm %s901_s4, 32 }
 0x15c   : > { %p623_p7 = scmp.ne.s32.totalorder %s842_s9, %s622_s14  ;;  %p627_p11 = scmp.lt.s32.totalorder %s842_s9, %s901_s4 }
 0x15d   : > { %p628_p12 = scmp.lt.s32.totalorder %s626_s26, %s622_s14 }
 0x15e   : > { %p624_p9 = pnand %p623_p7, %p755_p4 }
 0x15f   : > { %p629_p13 = por %p628_p12, %p627_p11 }
 0x160   : > { %p625_p10 = pneg %p624_p9 }
 0x162   : > { %p630_p0 = pnand %p629_p13, %p625_p10 }
 0x164   : > { %633 = shalt.err (!%p630_p0)
}
 0x165   : > { %538 = dma.vmem_to_hbm [thread:$0]  (%p755_p4), %s844_s5, 16, %s842_s9, %s390_s18   ;;  %v324_v60 = vrot.slane %v323_v59, 4  ;;  %v320_v1 = vld [vmem:[%s822_s24] sm:$0x1] }
 0x167   : > { %v325_v61 = vadd.f32 %v324_v60, %v323_v59 }
 0x169   : > { %v326_v62 = vrot.slane %v325_v61, 2 }
 0x16b   : > { %v327_v63 = vadd.f32 %v326_v62, %v325_v61 }
 0x16d   : > { %v328_v0 = vrot.slane %v327_v63, 1 }
 0x16f   : > { %v329_v2 = vadd.f32 %v328_v0, %v327_v63 }
 0x171   : > { %v330_v3 = vadd.f32 %v329_v2, %v320_v1 }
 0x173   : > { %332 = vst.msk [vmem:[%s822_s24] sm:$0x1] %vm284_vm0, %v330_v3 }
 0x174 PF: > { %p544_p1 = scmp.ge.s32.totalorder %s684_s20, 2  ;;  %s432_s25 = sand.u32 1, %s664_s15  }
 0x175   : > { %s433_s30 = scalar_lea.sflag [#allocation3], %s432_s25 }
 0x176   : > { %p541_p2 = pnand %p544_p1, %p762_p8 }
 0x178   : > { %p542_p3 = pneg %p541_p2 }
 0x17a   : > { %659 = dma.done.wait (%p542_p3), %s433_s30, 16  }
 0x17b   : > { %661 = vsyncadd (%p542_p3), %s433_s30, 4294967280  ;;  %s18_s20 = sadd.s32 1, %s684_s20   ;;  %s904_s15 = smov %s668_s16 }
 0x17c   : > { %p15_p4 = scmp.ge.s32.totalorder %s18_s20, 4   ;;  %s905_s16 = smov %s672_s17 }
 0x17d   : > { %s906_s17 = smov %s768_s28  ;;  %s907_s18 = smov %s680_s19 }
 0x17e   : > { %s908_s19 = smov %s910_s23  ;;  %17 = sbr.rel (!%p15_p4) target bundleno = 4 (0x4), region = 94 }
 0x183   :  { %437 = vsyncpa [#allocation3], 1 }
 0x184   :  { %439 = vsyncpa [#allocation3 + $0x1], 1 }

</bundles_post_ra>
